<compile_context>
chip_gen: v7x
topology: tpu7x:2x2x1
jax: 0.10.0
libtpu: 0.0.40
codegen_flags: <defaults>
</compile_context>

<pallas_src>
import functools
import math

import jax
import jax.numpy as jnp
from jax.experimental import pallas as pl
from jax.experimental.pallas import tpu as pltpu

_LOG_EPS = math.log(1e-7)


def _ngce_mae_kernel(pred_ref, labels_ref, out_ref, *, n_total, num_classes,
                     alpha, beta, q):
    i = pl.program_id(0)
    tn = pred_ref.shape[0]

    pred = pred_ref[...].astype(jnp.float32)              # (TN, C)
    labels = labels_ref[...]                               # (TN, 1) int32

    # --- softmax statistics (one full-tile exp; normalized p never built) ---
    m = jnp.max(pred, axis=1, keepdims=True)                # (TN, 1)
    e = jnp.exp(pred - m)                                   # (TN, C)  EUP pass #1
    row_sum = jnp.sum(e, axis=1, keepdims=True)             # (TN, 1), >= 1
    log_row_sum = jnp.log(row_sum)                          # per-row only

    # log-softmax: pure VPU work over the tile.
    logp = pred - m - log_row_sum                           # (TN, C)

    # --- clamped-softmax power: pc**q = exp(q * clip(logp, ln(eps), 0)) -----
    pc_pow_q = jnp.exp(q * jnp.clip(logp, _LOG_EPS, 0.0))   # (TN, C)  EUP pass #2
    denom = num_classes - jnp.sum(pc_pow_q, axis=1, keepdims=True)   # (TN, 1)

    # --- label-position log-probability, no one-hot materialized ------------
    class_ids = jax.lax.broadcasted_iota(jnp.int32, pred.shape, 1)
    is_label = class_ids == labels                           # (TN, C) bool
    logp_true = jnp.sum(jnp.where(is_label, logp, 0.0), axis=1, keepdims=True)

    # MAE term uses the unclamped softmax probability.
    p_true = jnp.exp(logp_true)                              # (TN, 1)
    mae = 1.0 - p_true

    # NGCE numerator uses the clamped probability (clip in log space).
    numer = 1.0 - jnp.exp(q * jnp.clip(logp_true, _LOG_EPS, 0.0))
    ngce = numer / denom                                     # (TN, 1)

    combined = alpha * ngce + beta * mae                     # (TN, 1)

    # --- drop padded tail rows (true vselect) and emit tile partial sum -----
    row_ids = i * tn + jax.lax.broadcasted_iota(jnp.int32, (tn, 1), 0)
    valid = row_ids < n_total
    out_ref[0, 0] = jnp.sum(jnp.where(valid, combined, 0.0))


def ngce_and_mae(pred, labels, num_classes, alpha=1.0, beta=1.0, q=0.7):
    n, c = pred.shape
    assert c == num_classes

    itemsize = int(jnp.dtype(pred.dtype).itemsize)
    # Sublane packing: row tiles must be multiples of 8 (f32) / 16 (bf16) / 32 (int8).
    row_align = max(8, 32 // max(itemsize, 1))
    c_pad = pl.cdiv(c, 128) * 128                            # lane-padded class width

    # Per-row VMEM bytes: 2 double-buffered input copies (input dtype) plus
    # ~5 f32 full-tile temporaries (upcast pred, e, logp, pc_pow_q, select),
    # all lane-padded, plus small per-row vectors.
    per_row_bytes = c_pad * (2 * itemsize + 5 * 4) + 64
    vmem_budget = 20 * 1024 * 1024                           # headroom under 48 MiB limit
    tn_cap = max(row_align,
                 (vmem_budget // per_row_bytes) // row_align * row_align)

    if n > tn_cap:
        tn = tn_cap
    elif n >= 2 * row_align:
        # The whole batch fits one tile, but split in two so both v7x
        # TensorCores get work on the "parallel" grid axis.
        half = pl.cdiv(n, 2)
        tn = pl.cdiv(half, row_align) * row_align            # <= n when n >= 2*row_align
    else:
        tn = n                                               # full-extent block (always legal)
    num_tiles = pl.cdiv(n, tn)

    labels_2d = labels.astype(jnp.int32).reshape(n, 1)
    kernel = functools.partial(
        _ngce_mae_kernel, n_total=n, num_classes=num_classes,
        alpha=float(alpha), beta=float(beta), q=float(q))

    partials = pl.pallas_call(
        kernel,
        out_shape=jax.ShapeDtypeStruct((num_tiles, 1), jnp.float32),
        grid=(num_tiles,),
        in_specs=[
            pl.BlockSpec((tn, c), lambda i: (i, 0)),         # pred rows
            pl.BlockSpec((tn, 1), lambda i: (i, 0)),         # label rows
        ],
        out_specs=pl.BlockSpec((1, 1), lambda i: (i, 0),
                               memory_space=pltpu.MemorySpace.SMEM),
        compiler_params=pltpu.CompilerParams(
            dimension_semantics=("parallel",),
            vmem_limit_bytes=48 * 1024 * 1024),
    )(pred, labels_2d)

    # TODO(synk): for LM-vocab-sized C, additionally tile the class axis with
    # online-softmax accumulators; for C << 128 a lane-dense (transposed)
    # layout would recover the ~C/128 lane-utilization loss.
    return jnp.sum(partials) / n


def _reference(pred, labels, num_classes, alpha, beta, q):
    p = jax.nn.softmax(pred.astype(jnp.float32), axis=1)
    oh = jax.nn.one_hot(labels, num_classes, dtype=jnp.float32)
    mae = 1.0 - jnp.sum(oh * p, axis=1)
    pc = jnp.clip(p, 1e-7, 1.0)
    numer = 1.0 - jnp.power(jnp.sum(oh * pc, axis=1), q)
    denom = num_classes - jnp.sum(jnp.power(pc, q), axis=1)
    ngce = numer / denom
    return alpha * jnp.mean(ngce) + beta * jnp.mean(mae)


if __name__ == "__main__":
    num_classes = 10
    batch = 8
    alpha = 1.0
    beta = 1.0
    q = 0.7

    key = jax.random.PRNGKey(0)
    k_pred, k_lab = jax.random.split(key)
    pred = jax.random.normal(k_pred, (batch, num_classes), dtype=jnp.float32)
    labels = jax.random.randint(k_lab, (batch,), 0, num_classes, dtype=jnp.int32)

    out = ngce_and_mae(pred, labels, num_classes, alpha, beta, q)
    out = jax.block_until_ready(out)

    ref = _reference(pred, labels, num_classes, alpha, beta, q)
    assert jnp.allclose(out, ref, rtol=1e-5, atol=1e-5), (out, ref)

    print("KERNEL_OK")
</pallas_src>

<mosaic_0001>
module attributes {stable_mosaic.version = 11 : i64} {
  func.func @_ngce_mae_kernel(%arg0: i32, %arg1: memref<8x10xf32, #tpu.memory_space<vmem>>, %arg2: memref<8x1xi32, #tpu.memory_space<vmem>>, %arg3: memref<1x1xf32, #tpu.memory_space<smem>>) attributes {dimension_semantics = [#tpu.dimension_semantics<parallel>], iteration_bounds = array<i64: 1>, scalar_prefetch = 0 : i64, scratch_operands = 0 : i64, tpu.core_type = #tpu.core_type<tc>, window_params = [{transform_indices = @transform_0, window_bounds = array<i64: 8, 10>}, {transform_indices = @transform_1, window_bounds = array<i64: 8, 1>}, {transform_indices = @transform_2, window_bounds = array<i64: 1, 1>}]} {
    %c0 = arith.constant 0 : index
    %c0_0 = arith.constant 0 : index
    %0 = vector.load %arg1[%c0, %c0_0] : memref<8x10xf32, #tpu.memory_space<vmem>>, vector<8x10xf32>
    %c0_1 = arith.constant 0 : index
    %c0_2 = arith.constant 0 : index
    %1 = vector.load %arg2[%c0_1, %c0_2] : memref<8x1xi32, #tpu.memory_space<vmem>>, vector<8x1xi32>
    %cst = arith.constant dense<0xFF800000> : vector<8xf32>
    %2 = vector.multi_reduction <maximumf>, %0, %cst [1] : vector<8x10xf32> to vector<8xf32>
    %3 = vector.shape_cast %2 : vector<8xf32> to vector<8x1xf32>
    %4 = vector.broadcast %3 : vector<8x1xf32> to vector<8x10xf32>
    %5 = arith.subf %0, %4 : vector<8x10xf32>
    %6 = math.exp %5 : vector<8x10xf32>
    %cst_3 = arith.constant dense<0.000000e+00> : vector<8xf32>
    %7 = vector.multi_reduction <add>, %6, %cst_3 [1] : vector<8x10xf32> to vector<8xf32>
    %8 = vector.shape_cast %7 : vector<8xf32> to vector<8x1xf32>
    %9 = math.log %8 : vector<8x1xf32>
    %10 = vector.broadcast %3 : vector<8x1xf32> to vector<8x10xf32>
    %11 = arith.subf %0, %10 : vector<8x10xf32>
    %12 = vector.broadcast %9 : vector<8x1xf32> to vector<8x10xf32>
    %13 = arith.subf %11, %12 : vector<8x10xf32>
    %cst_4 = arith.constant -16.1180954 : f32
    %cst_5 = arith.constant 0.000000e+00 : f32
    %14 = vector.broadcast %cst_4 : f32 to vector<8x10xf32>
    %15 = arith.maximumf %14, %13 : vector<8x10xf32>
    %16 = vector.broadcast %cst_5 : f32 to vector<8x10xf32>
    %17 = arith.minimumf %16, %15 : vector<8x10xf32>
    %cst_6 = arith.constant 0.699999988 : f32
    %18 = vector.broadcast %cst_6 : f32 to vector<8x10xf32>
    %19 = arith.mulf %18, %17 : vector<8x10xf32>
    %20 = math.exp %19 : vector<8x10xf32>
    %cst_7 = arith.constant dense<0.000000e+00> : vector<8xf32>
    %21 = vector.multi_reduction <add>, %20, %cst_7 [1] : vector<8x10xf32> to vector<8xf32>
    %22 = vector.shape_cast %21 : vector<8xf32> to vector<8x1xf32>
    %cst_8 = arith.constant 1.000000e+01 : f32
    %23 = vector.broadcast %cst_8 : f32 to vector<8x1xf32>
    %24 = arith.subf %23, %22 : vector<8x1xf32>
    %25 = tpu.iota {dimensions = array<i32: 1>} : vector<8x10xi32>
    %26 = vector.broadcast %1 : vector<8x1xi32> to vector<8x10xi32>
    %27 = arith.cmpi eq, %25, %26 : vector<8x10xi32>
    %cst_9 = arith.constant 0.000000e+00 : f32
    %28 = vector.broadcast %cst_9 : f32 to vector<8x10xf32>
    %29 = arith.select %27, %13, %28 : vector<8x10xi1>, vector<8x10xf32>
    %cst_10 = arith.constant dense<0.000000e+00> : vector<8xf32>
    %30 = vector.multi_reduction <add>, %29, %cst_10 [1] : vector<8x10xf32> to vector<8xf32>
    %31 = vector.shape_cast %30 : vector<8xf32> to vector<8x1xf32>
    %32 = math.exp %31 : vector<8x1xf32>
    %cst_11 = arith.constant 1.000000e+00 : f32
    %33 = vector.broadcast %cst_11 : f32 to vector<8x1xf32>
    %34 = arith.subf %33, %32 : vector<8x1xf32>
    %cst_12 = arith.constant -16.1180954 : f32
    %cst_13 = arith.constant 0.000000e+00 : f32
    %35 = vector.broadcast %cst_12 : f32 to vector<8x1xf32>
    %36 = arith.maximumf %35, %31 : vector<8x1xf32>
    %37 = vector.broadcast %cst_13 : f32 to vector<8x1xf32>
    %38 = arith.minimumf %37, %36 : vector<8x1xf32>
    %cst_14 = arith.constant 0.699999988 : f32
    %39 = vector.broadcast %cst_14 : f32 to vector<8x1xf32>
    %40 = arith.mulf %39, %38 : vector<8x1xf32>
    %41 = math.exp %40 : vector<8x1xf32>
    %cst_15 = arith.constant 1.000000e+00 : f32
    %42 = vector.broadcast %cst_15 : f32 to vector<8x1xf32>
    %43 = arith.subf %42, %41 : vector<8x1xf32>
    %44 = arith.divf %43, %24 : vector<8x1xf32>
    %cst_16 = arith.constant 1.000000e+00 : f32
    %45 = vector.broadcast %cst_16 : f32 to vector<8x1xf32>
    %46 = arith.mulf %45, %44 : vector<8x1xf32>
    %cst_17 = arith.constant 1.000000e+00 : f32
    %47 = vector.broadcast %cst_17 : f32 to vector<8x1xf32>
    %48 = arith.mulf %47, %34 : vector<8x1xf32>
    %49 = arith.addf %46, %48 : vector<8x1xf32>
    %c8_i32 = arith.constant 8 : i32
    %50 = arith.muli %arg0, %c8_i32 : i32
    %51 = tpu.iota {dimensions = array<i32: 0>} : vector<8x1xi32>
    %52 = vector.broadcast %50 : i32 to vector<8x1xi32>
    %53 = arith.addi %52, %51 : vector<8x1xi32>
    %c8_i32_18 = arith.constant 8 : i32
    %54 = vector.broadcast %c8_i32_18 : i32 to vector<8x1xi32>
    %55 = arith.cmpi slt, %53, %54 : vector<8x1xi32>
    %cst_19 = arith.constant 0.000000e+00 : f32
    %56 = vector.broadcast %cst_19 : f32 to vector<8x1xf32>
    %57 = arith.select %55, %49, %56 : vector<8x1xi1>, vector<8x1xf32>
    %58 = vector.shape_cast %57 : vector<8x1xf32> to vector<1x8x1xf32>
    %cst_20 = arith.constant dense<0.000000e+00> : vector<1xf32>
    %59 = vector.multi_reduction <add>, %58, %cst_20 [1, 2] : vector<1x8x1xf32> to vector<1xf32>
    %60 = vector.shape_cast %59 : vector<1xf32> to vector<1x1x1xf32>
    %61 = vector.extract %60[0, 0, 0] : f32 from vector<1x1x1xf32>
    %c0_21 = arith.constant 0 : index
    %c0_22 = arith.constant 0 : index
    %62 = memref.load %arg3[%c0_21, %c0_22] : memref<1x1xf32, #tpu.memory_space<smem>>
    memref.store %61, %arg3[%c0_21, %c0_22] : memref<1x1xf32, #tpu.memory_space<smem>>
    return
  }
  func.func @transform_0(%arg0: i32) -> (i32, i32) {
    %c0_i32 = arith.constant 0 : i32
    %c0_i32_0 = arith.constant 0 : i32
    return %arg0, %c0_i32 : i32, i32
  }
  func.func @transform_1(%arg0: i32) -> (i32, i32) {
    %c0_i32 = arith.constant 0 : i32
    %c0_i32_0 = arith.constant 0 : i32
    return %arg0, %c0_i32 : i32, i32
  }
  func.func @transform_2(%arg0: i32) -> (i32, i32) {
    %c0_i32 = arith.constant 0 : i32
    %c0_i32_0 = arith.constant 0 : i32
    return %arg0, %c0_i32 : i32, i32
  }
}

</mosaic_0001>

<bundles_post_ra>
// kernel: tpu_custom_call.1
= control target key start
LH: loop header
LB: loop body
LE: loop exit
PB: predicated region body
PF: predicated region fallthrough
CT: control target
= control target key end

     0   :  { %vm14_vm0 = vcmask 80896   ;;  %s160_s0 = inlined_call_operand.vmem [shape: f32[8,10], index: 0, kind: input, shape index: {}]   ;;  %s161_s1 = inlined_call_operand.vmem [shape: s32[8,1], index: 1, kind: input, shape index: {}]   ;;  %s162_s2 = inlined_call_operand.hbm [shape: f32[1,1], index: 2, kind: output, shape index: {}]  }
   0x1   :  { %v12_v0 = vld [vmem:[%s160_s0] sm:$0xff] }
   0x2   :  { %7 = vsyncpa [#allocation3], 0  ;;  %v15_v1 = vsel %vm14_vm0, %v12_v0, -inf  ;;  %v13_v2 = vld [vmem:[%s161_s1] sm:$0xff]  ;;  %v121_v3 = vmov 0   ;;  %v36_v10 = vlaneseq  ;;  %vm65_vm2 = vcmask 7168  }
   0x3   :  { %16 = vmax.xlane.f32.xlu0 %v15_v1  ;;  %95 = vset.pattern.permute.xlu1 %v121_v3  ;;  %s109_s14 = scalar_lea.hbm %s162_s2, 16 }
   0x4   :  { %96 = vset.pattern.permute.xlu0 %v121_v3  ;;  %39 = vperm.xlu1 %95, %v13_v2   ;;  %v37_v11 = vand.u32 127, %v36_v10  ;;  %p110_p0 = scmp.ne.s32.totalorder %s162_s2, %s109_s14  ;;  %p113_p1 = scmp.lt.u32.totalorder %s109_s14, %s162_s2 }
   0x6   :  { %p115_p2 = pnand %p113_p1, %p110_p0 }
  0x83   :  { %v40_v12 = vpop.permute.xlu1 %39 }
  0x84   :  { %vm41_vm1 = vcmp.eq.s32.totalorder %v37_v11, %v40_v12 }
  0x90   :  { %v17_v4 = vpop.xlane.xlu0 %16 }
  0x91   :  { %v18_v5 = vsub.f32 %v12_v0, %v17_v4 }
  0x93   :  { %v19_v6 = vmul.f32 1.442695, %v18_v5 }
  0x95   :  { %97 = vpow2.f32 %v19_v6 }
  0x9f   :  { %v98_v7 = vpop.eup %97 }
  0xa0   :  { %v21_v8 = vsel %vm14_vm0, %v98_v7, 0.0 }
  0xa1   :  { %22 = vadd.xlane.f32.xlu0 %v21_v8 }
 0x12e   :  { %v23_v9 = vpop.xlane.xlu0 %22 }
 0x12f   :  { %99 = vlog2.f32 %v23_v9 }
 0x139   :  { %v100_v13 = vpop.eup %99 }
 0x13a   :  { %v25_v14 = vmul.f32 0.6931472, %v100_v13 }
 0x13c   :  { %v26_v15 = vsub.f32 %v18_v5, %v25_v14 }
 0x13e   :  { %v42_v16 = vsel %vm41_vm1, %v26_v15, 0.0  ;;  %v27_v17 = vmax.f32 %v26_v15, -16.118095 }
 0x13f   :  { %v43_v18 = vsel %vm14_vm0, %v42_v16, 0.0 }
 0x140   :  { %44 = vadd.xlane.f32.xlu1 %v43_v18  ;;  %v28_v19 = vmin.f32 %v27_v17, 0.0 }
 0x142   :  { %v29_v20 = vmul.f32 0.7, %v28_v19 }
 0x144   :  { %v30_v21 = vmul.f32 1.442695, %v29_v20 }
 0x146   :  { %101 = vpow2.f32 %v30_v21 }
 0x150   :  { %v102_v22 = vpop.eup %101 }
 0x151   :  { %v32_v23 = vsel %vm14_vm0, %v102_v22, 0.0 }
 0x152   :  { %33 = vadd.xlane.f32.xlu0 %v32_v23 }
 0x1cd   :  { %v45_v24 = vpop.xlane.xlu1 %44 }
 0x1ce   :  { %v49_v25 = vmax.f32 %v45_v24, -16.118095  ;;  %v46_v29 = vmul.f32 1.442695, %v45_v24 }
 0x1d0   :  { %v50_v26 = vmin.f32 %v49_v25, 0.0 }
 0x1d2   :  { %v51_v27 = vmul.f32 0.7, %v50_v26 }
 0x1d4   :  { %v52_v28 = vmul.f32 1.442695, %v51_v27 }
 0x1d6   :  { %103 = vpow2.f32 %v52_v28 }
 0x1d7   :  { %105 = vpow2.f32 %v46_v29 }
 0x1df   :  { %v34_v30 = vpop.xlane.xlu0 %33 }
 0x1e0   :  { %v35_v31 = vsub.f32 10.0, %v34_v30  ;;  %v104_v32 = vpop.eup %103 }
 0x1e1   :  { %v106_v33 = vpop.eup %105  ;;  %v54_v34 = vsub.f32 1.0, %v104_v32 }
 0x1e2   :  { %107 = vrcp.f32 %v35_v31  ;;  %v48_v36 = vsub.f32 1.0, %v106_v33 }
 0x1ec   :  { %v108_v35 = vpop.eup %107 }
 0x1ed   :  { %v56_v37 = vmul.f32 %v108_v35, %v54_v34 }
 0x1ef   :  { %v57_v38 = vadd.f32 %v56_v37, %v48_v36 }
 0x1f1   :  { %v66_v39 = vsel %vm65_vm2, %v57_v38, 0.0 }
 0x1f2   :  { %67 = vadd.xlane.f32.xlu0 %v66_v39 }
 0x27f   :  { %v68_v40 = vpop.xlane.xlu0 %67 }
 0x280   :  { %v69_v41 = vrot.slane %v68_v40, 4 }
 0x282   :  { %v70_v42 = vadd.f32 %v69_v41, %v68_v40 }
 0x284   :  { %v71_v43 = vrot.slane %v70_v42, 2 }
 0x286   :  { %v72_v44 = vadd.f32 %v71_v43, %v70_v42 }
 0x288   :  { %v73_v45 = vrot.slane %v72_v44, 1 }
 0x28a   :  { %v74_v46 = vadd.f32 %v73_v45, %v72_v44 }
 0x28c   :  { %91 = vpush %v74_v46 }
 0x2bd   :  { %s92_s0 = spop %91 }
 0x2be   :  { %77 = sst [smem:[#allocation2]] %s92_s0 }
 0x2bf   :  { %118 = shalt.err (!%p115_p2)
}
 0x2c0   :  { %s122_s19 = smov [#allocation2]  }
 0x2c1   :  { %85 = dma.smem_to_hbm %s122_s19, 16, %s162_s2, [#allocation3]  }
 0x2c2   :  { %119 = dma.done.wait [#allocation3], 16  }
 0x2c3   :  { %120 = vsyncadd [#allocation3], 4294967280 }
 0x2c4   :  { %89 = sfence }
 0x2c5   :  { %90 = vsyncpa [#allocation3], 1 }

</bundles_post_ra>
